<compile_context>
chip_gen: v7x
topology: tpu7x:2x2x1
jax: 0.10.0
libtpu: 0.0.40
codegen_flags: <defaults>
</compile_context>

<pallas_src>
import functools

import jax
import jax.numpy as jnp
from jax import lax
from jax.experimental import pallas as pl
from jax.experimental.pallas import tpu as pltpu

_TWO_PI = 6.283185307179586
_INV_TWO_PI = 1.0 / _TWO_PI


def _cdiv(a, b):
    return -(-a // b)


def _wrap_to_pi(d):
    # Wrap an angular difference to [-pi, pi).  Written FMA-friendly:
    # (d*inv2pi + 0.5) -> floor -> (d - 2pi*floor) so Mosaic can fuse mul+add / mul+sub.
    return d - _TWO_PI * jnp.floor(d * _INV_TWO_PI + 0.5)


def _build_kernel(tile_r, lanes, cr, rows_valid, nk):
    """Sum of squared wrapped differences over (tile_r, lanes) blocks.

    The accumulator is a small (8, lanes) VMEM slab persisting across the k grid axis.
    Each chunk of `cr` input rows (cr = sublane packing of the input dtype) is loaded,
    upcast to f32, wrapped, squared and folded onto 8 sublanes -- no full-tile temporary.
    Rows at/beyond `rows_valid` (grid overhang or clamped duplicate blocks) are masked,
    and only blocks that can actually be ragged pay for the mask.  The last k step folds
    lanes down to an (8, 128) per-lane partial (128 is even, so theta/phi lane parity is
    preserved); the even/odd split + scalar epilogue happen in the XLA wrapper.
    """
    n_chunks = tile_r // cr

    def chunk_sq(p_ref, t_ref, r0, row0, masked):
        p = p_ref[pl.ds(r0, cr), :].astype(jnp.float32)
        t = t_ref[pl.ds(r0, cr), :].astype(jnp.float32)
        w = _wrap_to_pi(p - t)
        ww = w * w
        if masked:
            gr = row0 + r0 + lax.broadcasted_iota(jnp.int32, (cr, lanes), 0)
            ww = jnp.where(gr < rows_valid, ww, 0.0)
        folded = ww[0:8, :]
        for g in range(1, cr // 8):          # cr in {8, 16, 32}
            folded = folded + ww[g * 8:(g + 1) * 8, :]
        return folded

    def kernel(p_ref, t_ref, o_ref, acc_ref):
        s = pl.program_id(0)
        k = pl.program_id(1)

        @pl.when(k == 0)
        def _():
            acc_ref[...] = jnp.zeros_like(acc_ref)

        row0 = (s * nk + k) * tile_r          # first (unclamped) global row of this block

        def accumulate(masked):
            def body(i, part):
                r0 = pl.multiple_of(i * cr, cr)
                return part + chunk_sq(p_ref, t_ref, r0, row0, masked)
            part = lax.fori_loop(0, n_chunks, body,
                                 jnp.zeros((8, lanes), jnp.float32),
                                 unroll=min(n_chunks, 8))
            acc_ref[...] += part

        is_full = row0 + tile_r <= rows_valid

        @pl.when(is_full)                     # fast path: zero masking cost
        def _():
            accumulate(False)

        @pl.when(jnp.logical_not(is_full))    # ragged tail / clamped duplicate blocks
        def _():
            accumulate(True)

        @pl.when(k == nk - 1)
        def _():
            folded = acc_ref[:, 0:128]
            for c in range(1, lanes // 128):
                folded = folded + acc_ref[:, c * 128:(c + 1) * 128]
            o_ref[...] = folded

    return kernel


def _default_n_split():
    # The 2-way row split only pays on chips with 2 TensorCores (megacore): v4 / v5p / v7x.
    try:
        kind = jax.devices()[0].device_kind.lower()
    except Exception:
        return 1
    return 2 if any(t in kind for t in ("v7", "v4", "v5p", "v5 p")) else 1


def _pick_lanes(total, cr, max_lanes):
    # Largest multiple of 128 that divides `total` and leaves at least `cr` rows.
    best = 0
    for l in range(128, max_lanes + 1, 128):
        if total % l == 0 and total // l >= cr:
            best = l
    return best


@functools.partial(jax.jit,
                   static_argnames=("radius", "n_split", "max_lanes", "max_tile_rows"))
def spherical_axis_aligned_arc_loss(y_pred, y_true, radius=None, n_split=None,
                                    max_lanes=2048, max_tile_rows=512):
    """y_pred, y_true: (..., 2) float arrays of (theta, phi) angles. Returns scalar f32."""
    assert y_pred.shape == y_true.shape and y_pred.shape[-1] == 2
    r = 1.0 if radius is None else float(radius)

    dtype = jnp.promote_types(y_pred.dtype, y_true.dtype)
    if not jnp.issubdtype(dtype, jnp.floating) or dtype == jnp.float64:
        dtype = jnp.float32          # TODO(synk): float64 inputs are demoted to f32
    itemsize = jnp.dtype(dtype).itemsize
    cr = {4: 8, 2: 16, 1: 32}.get(itemsize, 8)   # sublane packing of the input dtype

    p_flat = y_pred.reshape(-1)      # interleaved [theta, phi, theta, phi, ...]
    t_flat = y_true.reshape(-1)
    if p_flat.dtype != dtype:
        p_flat = p_flat.astype(dtype)
    if t_flat.dtype != dtype:
        t_flat = t_flat.astype(dtype)

    total = p_flat.shape[0]
    assert total >= 2
    n_per_axis = total // 2

    lanes = _pick_lanes(total, cr, max_lanes)
    if lanes:
        rows = total // lanes        # zero-copy: row-major reshape is layout-trivial
        p2 = p_flat.reshape(rows, lanes)
        t2 = t_flat.reshape(rows, lanes)
    else:
        # total not divisible by 128: no lane-dense zero-copy view exists -> minimal zero
        # pad (pad pred = pad true = 0 -> wrapped diff = 0 -> contributes 0 to the sum).
        lanes = max(128, (min(1024, max_lanes) // 128) * 128)
        rows = max(cr, _cdiv(total, lanes))
        pad = rows * lanes - total
        p2 = jnp.pad(p_flat, (0, pad)).reshape(rows, lanes)
        t2 = jnp.pad(t_flat, (0, pad)).reshape(rows, lanes)

    tile_r = (max(cr, min(max_tile_rows, rows)) // cr) * cr
    n_blocks = _cdiv(rows, tile_r)

    if n_split is None:
        n_split = _default_n_split()
    n_split = max(1, min(int(n_split), n_blocks))
    nk = _cdiv(n_blocks, n_split)
    last_block = n_blocks - 1

    def in_map(s, k):
        # Clamp so an uneven split never produces a fully out-of-range block; the kernel
        # masks duplicates via the *unclamped* row index, so they contribute exactly zero.
        return (jnp.minimum(s * nk + k, last_block), 0)

    block_bytes = tile_r * lanes * itemsize
    vmem_limit = int(min(max(32 * 1024 * 1024, 5 * block_bytes + (2 << 20)),
                         100 * 1024 * 1024))

    kernel = _build_kernel(tile_r, lanes, cr, rows, nk)

    out = pl.pallas_call(
        kernel,
        out_shape=jax.ShapeDtypeStruct((n_split * 8, 128), jnp.float32),
        grid_spec=pltpu.PrefetchScalarGridSpec(
            num_scalar_prefetch=0,
            grid=(n_split, nk),
            in_specs=[pl.BlockSpec((tile_r, lanes), in_map),
                      pl.BlockSpec((tile_r, lanes), in_map)],
            out_specs=pl.BlockSpec((8, 128), lambda s, k: (s, 0)),
            scratch_shapes=[pltpu.VMEM((8, lanes), jnp.float32)],
        ),
        compiler_params=pltpu.CompilerParams(
            dimension_semantics=("parallel", "arbitrary"),
            vmem_limit_bytes=vmem_limit),
    )(p2, t2)

    # Scalar epilogue hoisted out of the kernel: even lanes carry theta, odd lanes phi.
    col = out.reshape(n_split * 8, 128).sum(axis=0)
    s_theta = col[0::2].sum()
    s_phi = col[1::2].sum()
    inv_n = 1.0 / float(n_per_axis)
    theta = jnp.sqrt(s_theta * inv_n)
    phi = jnp.sqrt(s_phi * inv_n)
    return (r * (theta + phi)).astype(jnp.float32)


def reference_loss(y_pred, y_true, radius=None):
    """Pure-JAX transcription of the PyTorch forward for validation."""
    r = 1.0 if radius is None else float(radius)
    p = y_pred.astype(jnp.float32)
    t = y_true.astype(jnp.float32)
    arc_t = r * jnp.abs(_wrap_to_pi(p[..., 0] - t[..., 0]))
    arc_p = r * jnp.abs(_wrap_to_pi(p[..., 1] - t[..., 1]))
    return jnp.sqrt(jnp.mean(arc_t ** 2)) + jnp.sqrt(jnp.mean(arc_p ** 2))


if __name__ == "__main__":
    pi = 3.141592653589793
    key = jax.random.PRNGKey(0)
    kp, kt = jax.random.split(key)

    # Main example: (batch, H, W, 2) spherical-coordinate predictions.
    B, H, W = 2, 64, 32
    y_pred = jax.random.uniform(kp, (B, H, W, 2), jnp.float32, minval=-pi, maxval=pi)
    y_true = jax.random.uniform(kt, (B, H, W, 2), jnp.float32, minval=-pi, maxval=pi)
    loss = jax.block_until_ready(spherical_axis_aligned_arc_loss(y_pred, y_true))
    ref = reference_loss(y_pred, y_true)
    assert loss.shape == () and loss.dtype == jnp.float32
    assert jnp.allclose(loss, ref, rtol=1e-4, atol=1e-5), (loss, ref)

    # Ragged-row zero-copy path (rows=9 -> masked overhang) + radius scaling.
    y_pred2 = jax.random.uniform(kp, (576, 2), jnp.float32, minval=-pi, maxval=pi)
    y_true2 = jax.random.uniform(kt, (576, 2), jnp.float32, minval=-pi, maxval=pi)
    loss2 = jax.block_until_ready(
        spherical_axis_aligned_arc_loss(y_pred2, y_true2, radius=2.5))
    ref2 = reference_loss(y_pred2, y_true2, radius=2.5)
    assert jnp.allclose(loss2, ref2, rtol=1e-4, atol=1e-5), (loss2, ref2)

    # Multi-block accumulation, forced 2-way split (clamped duplicate block), bf16 ingest.
    y_pred3 = jax.random.uniform(kp, (4, 768, 2), jnp.float32,
                                 minval=-pi, maxval=pi).astype(jnp.bfloat16)
    y_true3 = jax.random.uniform(kt, (4, 768, 2), jnp.float32,
                                 minval=-pi, maxval=pi).astype(jnp.bfloat16)
    loss3 = jax.block_until_ready(
        spherical_axis_aligned_arc_loss(y_pred3, y_true3, n_split=2,
                                        max_lanes=128, max_tile_rows=16))
    ref3 = reference_loss(y_pred3, y_true3)
    assert jnp.allclose(loss3, ref3, rtol=1e-3, atol=1e-4), (loss3, ref3)

    # Total not divisible by 128 -> minimal pad fallback path.
    y_pred4 = jax.random.uniform(kp, (3, 37, 2), jnp.float32, minval=-pi, maxval=pi)
    y_true4 = jax.random.uniform(kt, (3, 37, 2), jnp.float32, minval=-pi, maxval=pi)
    loss4 = jax.block_until_ready(spherical_axis_aligned_arc_loss(y_pred4, y_true4))
    ref4 = reference_loss(y_pred4, y_true4)
    assert jnp.allclose(loss4, ref4, rtol=1e-4, atol=1e-5), (loss4, ref4)

    print("KERNEL_OK")
</pallas_src>

<mosaic_0001>
module attributes {stable_mosaic.version = 11 : i64} {
  func.func @kernel(%arg0: i32, %arg1: i32, %arg2: memref<8x1024xf32, #tpu.memory_space<vmem>>, %arg3: memref<8x1024xf32, #tpu.memory_space<vmem>>, %arg4: memref<8x128xf32, #tpu.memory_space<vmem>>, %arg5: memref<8x1024xf32, #tpu.memory_space<vmem>>) attributes {dimension_semantics = [#tpu.dimension_semantics<parallel>, #tpu.dimension_semantics<arbitrary>], iteration_bounds = array<i64: 1, 1>, scalar_prefetch = 0 : i64, scratch_operands = 1 : i64, tpu.core_type = #tpu.core_type<tc>, window_params = [{transform_indices = @transform_0, window_bounds = array<i64: 8, 1024>}, {transform_indices = @transform_1, window_bounds = array<i64: 8, 1024>}, {transform_indices = @transform_2, window_bounds = array<i64: 8, 128>}]} {
    %c0_i32 = arith.constant 0 : i32
    %0 = arith.cmpi eq, %arg1, %c0_i32 : i32
    %1 = arith.extui %0 : i1 to i32
    %c0_i32_0 = arith.constant 0 : i32
    %2 = arith.cmpi ne, %1, %c0_i32_0 : i32
    scf.if %2 {
      %cst = arith.constant 0.000000e+00 : f32
      %16 = vector.broadcast %cst : f32 to vector<8x1024xf32>
      %c0 = arith.constant 0 : index
      %c0_7 = arith.constant 0 : index
      %17 = vector.load %arg5[%c0, %c0_7] : memref<8x1024xf32, #tpu.memory_space<vmem>>, vector<8x1024xf32>
      tpu.vector_store %arg5[%c0, %c0_7], %16 {strides = array<i32>} : memref<8x1024xf32, #tpu.memory_space<vmem>>, vector<8x1024xf32>,
    } else {
    }
    %c1_i32 = arith.constant 1 : i32
    %3 = arith.muli %arg0, %c1_i32 : i32
    %4 = arith.addi %3, %arg1 : i32
    %c8_i32 = arith.constant 8 : i32
    %5 = arith.muli %4, %c8_i32 : i32
    %c8_i32_1 = arith.constant 8 : i32
    %6 = arith.addi %5, %c8_i32_1 : i32
    %c8_i32_2 = arith.constant 8 : i32
    %7 = arith.cmpi sle, %6, %c8_i32_2 : i32
    %8 = arith.extui %7 : i1 to i32
    %c0_i32_3 = arith.constant 0 : i32
    %9 = arith.cmpi ne, %8, %c0_i32_3 : i32
    scf.if %9 {
      %cst = arith.constant 0.000000e+00 : f32
      %16 = vector.broadcast %cst : f32 to vector<8x1024xf32>
      %c0_i32_7 = arith.constant 0 : i32
      %c8_i32_8 = arith.constant 8 : i32
      %17 = arith.muli %c0_i32_7, %c8_i32_8 : i32
      %18 = tpu.assume_multiple %17, 8 : i32
      %19 = arith.index_cast %18 : i32 to index
      %c0 = arith.constant 0 : index
      %20 = vector.load %arg2[%19, %c0] : memref<8x1024xf32, #tpu.memory_space<vmem>>, vector<8x1024xf32>
      %21 = arith.index_cast %18 : i32 to index
      %c0_9 = arith.constant 0 : index
      %22 = vector.load %arg3[%21, %c0_9] : memref<8x1024xf32, #tpu.memory_space<vmem>>, vector<8x1024xf32>
      %23 = arith.subf %20, %22 : vector<8x1024xf32>
      %cst_10 = arith.constant 0.159154937 : f32
      %24 = vector.broadcast %cst_10 : f32 to vector<8x1024xf32>
      %25 = arith.mulf %23, %24 : vector<8x1024xf32>
      %cst_11 = arith.constant 5.000000e-01 : f32
      %26 = vector.broadcast %cst_11 : f32 to vector<8x1024xf32>
      %27 = arith.addf %25, %26 : vector<8x1024xf32>
      %28 = math.floor %27 : vector<8x1024xf32>
      %cst_12 = arith.constant 6.28318548 : f32
      %29 = vector.broadcast %cst_12 : f32 to vector<8x1024xf32>
      %30 = arith.mulf %29, %28 : vector<8x1024xf32>
      %31 = arith.subf %23, %30 : vector<8x1024xf32>
      %32 = arith.mulf %31, %31 : vector<8x1024xf32>
      %33 = arith.addf %16, %32 : vector<8x1024xf32>
      %c1_i32_13 = arith.constant 1 : i32
      %c0_14 = arith.constant 0 : index
      %c0_15 = arith.constant 0 : index
      %34 = vector.load %arg5[%c0_14, %c0_15] : memref<8x1024xf32, #tpu.memory_space<vmem>>, vector<8x1024xf32>
      %35 = arith.addf %34, %33 : vector<8x1024xf32>
      %c0_16 = arith.constant 0 : index
      %c0_17 = arith.constant 0 : index
      %36 = vector.load %arg5[%c0_16, %c0_17] : memref<8x1024xf32, #tpu.memory_space<vmem>>, vector<8x1024xf32>
      tpu.vector_store %arg5[%c0_16, %c0_17], %35 {strides = array<i32>} : memref<8x1024xf32, #tpu.memory_space<vmem>>, vector<8x1024xf32>,
    } else {
    }
    %true = arith.constant true
    %10 = arith.xori %7, %true : i1
    %11 = arith.extui %10 : i1 to i32
    %c0_i32_4 = arith.constant 0 : i32
    %12 = arith.cmpi ne, %11, %c0_i32_4 : i32
    scf.if %12 {
      %cst = arith.constant 0.000000e+00 : f32
      %16 = vector.broadcast %cst : f32 to vector<8x1024xf32>
      %c0_i32_7 = arith.constant 0 : i32
      %c8_i32_8 = arith.constant 8 : i32
      %17 = arith.muli %c0_i32_7, %c8_i32_8 : i32
      %18 = tpu.assume_multiple %17, 8 : i32
      %19 = arith.index_cast %18 : i32 to index
      %c0 = arith.constant 0 : index
      %20 = vector.load %arg2[%19, %c0] : memref<8x1024xf32, #tpu.memory_space<vmem>>, vector<8x1024xf32>
      %21 = arith.index_cast %18 : i32 to index
      %c0_9 = arith.constant 0 : index
      %22 = vector.load %arg3[%21, %c0_9] : memref<8x1024xf32, #tpu.memory_space<vmem>>, vector<8x1024xf32>
      %23 = arith.subf %20, %22 : vector<8x1024xf32>
      %cst_10 = arith.constant 0.159154937 : f32
      %24 = vector.broadcast %cst_10 : f32 to vector<8x1024xf32>
      %25 = arith.mulf %23, %24 : vector<8x1024xf32>
      %cst_11 = arith.constant 5.000000e-01 : f32
      %26 = vector.broadcast %cst_11 : f32 to vector<8x1024xf32>
      %27 = arith.addf %25, %26 : vector<8x1024xf32>
      %28 = math.floor %27 : vector<8x1024xf32>
      %cst_12 = arith.constant 6.28318548 : f32
      %29 = vector.broadcast %cst_12 : f32 to vector<8x1024xf32>
      %30 = arith.mulf %29, %28 : vector<8x1024xf32>
      %31 = arith.subf %23, %30 : vector<8x1024xf32>
      %32 = arith.mulf %31, %31 : vector<8x1024xf32>
      %33 = arith.addi %5, %18 : i32
      %34 = tpu.iota {dimensions = array<i32: 0>} : vector<8x1024xi32>
      %35 = vector.broadcast %33 : i32 to vector<8x1024xi32>
      %36 = arith.addi %35, %34 : vector<8x1024xi32>
      %c8_i32_13 = arith.constant 8 : i32
      %37 = vector.broadcast %c8_i32_13 : i32 to vector<8x1024xi32>
      %38 = arith.cmpi slt, %36, %37 : vector<8x1024xi32>
      %cst_14 = arith.constant 0.000000e+00 : f32
      %39 = vector.broadcast %cst_14 : f32 to vector<8x1024xf32>
      %40 = arith.select %38, %32, %39 : vector<8x1024xi1>, vector<8x1024xf32>
      %41 = arith.addf %16, %40 : vector<8x1024xf32>
      %c1_i32_15 = arith.constant 1 : i32
      %c0_16 = arith.constant 0 : index
      %c0_17 = arith.constant 0 : index
      %42 = vector.load %arg5[%c0_16, %c0_17] : memref<8x1024xf32, #tpu.memory_space<vmem>>, vector<8x1024xf32>
      %43 = arith.addf %42, %41 : vector<8x1024xf32>
      %c0_18 = arith.constant 0 : index
      %c0_19 = arith.constant 0 : index
      %44 = vector.load %arg5[%c0_18, %c0_19] : memref<8x1024xf32, #tpu.memory_space<vmem>>, vector<8x1024xf32>
      tpu.vector_store %arg5[%c0_18, %c0_19], %43 {strides = array<i32>} : memref<8x1024xf32, #tpu.memory_space<vmem>>, vector<8x1024xf32>,
    } else {
    }
    %c0_i32_5 = arith.constant 0 : i32
    %13 = arith.cmpi eq, %arg1, %c0_i32_5 : i32
    %14 = arith.extui %13 : i1 to i32
    %c0_i32_6 = arith.constant 0 : i32
    %15 = arith.cmpi ne, %14, %c0_i32_6 : i32
    scf.if %15 {
      %c0 = arith.constant 0 : index
      %c0_7 = arith.constant 0 : index
      %16 = vector.load %arg5[%c0, %c0_7] : memref<8x1024xf32, #tpu.memory_space<vmem>>, vector<8x128xf32>
      %c0_8 = arith.constant 0 : index
      %c128 = arith.constant 128 : index
      %17 = vector.load %arg5[%c0_8, %c128] : memref<8x1024xf32, #tpu.memory_space<vmem>>, vector<8x128xf32>
      %18 = arith.addf %16, %17 : vector<8x128xf32>
      %c0_9 = arith.constant 0 : index
      %c256 = arith.constant 256 : index
      %19 = vector.load %arg5[%c0_9, %c256] : memref<8x1024xf32, #tpu.memory_space<vmem>>, vector<8x128xf32>
      %20 = arith.addf %18, %19 : vector<8x128xf32>
      %c0_10 = arith.constant 0 : index
      %c384 = arith.constant 384 : index
      %21 = vector.load %arg5[%c0_10, %c384] : memref<8x1024xf32, #tpu.memory_space<vmem>>, vector<8x128xf32>
      %22 = arith.addf %20, %21 : vector<8x128xf32>
      %c0_11 = arith.constant 0 : index
      %c512 = arith.constant 512 : index
      %23 = vector.load %arg5[%c0_11, %c512] : memref<8x1024xf32, #tpu.memory_space<vmem>>, vector<8x128xf32>
      %24 = arith.addf %22, %23 : vector<8x128xf32>
      %c0_12 = arith.constant 0 : index
      %c640 = arith.constant 640 : index
      %25 = vector.load %arg5[%c0_12, %c640] : memref<8x1024xf32, #tpu.memory_space<vmem>>, vector<8x128xf32>
      %26 = arith.addf %24, %25 : vector<8x128xf32>
      %c0_13 = arith.constant 0 : index
      %c768 = arith.constant 768 : index
      %27 = vector.load %arg5[%c0_13, %c768] : memref<8x1024xf32, #tpu.memory_space<vmem>>, vector<8x128xf32>
      %28 = arith.addf %26, %27 : vector<8x128xf32>
      %c0_14 = arith.constant 0 : index
      %c896 = arith.constant 896 : index
      %29 = vector.load %arg5[%c0_14, %c896] : memref<8x1024xf32, #tpu.memory_space<vmem>>, vector<8x128xf32>
      %30 = arith.addf %28, %29 : vector<8x128xf32>
      %c0_15 = arith.constant 0 : index
      %c0_16 = arith.constant 0 : index
      %31 = vector.load %arg4[%c0_15, %c0_16] : memref<8x128xf32, #tpu.memory_space<vmem>>, vector<8x128xf32>
      tpu.vector_store %arg4[%c0_15, %c0_16], %30 {strides = array<i32>} : memref<8x128xf32, #tpu.memory_space<vmem>>, vector<8x128xf32>,
    } else {
    }
    return
  }
  func.func @transform_0(%arg0: i32, %arg1: i32) -> (i32, i32) {
    %c1_i32 = arith.constant 1 : i32
    %0 = arith.muli %arg0, %c1_i32 : i32
    %1 = arith.addi %0, %arg1 : i32
    %c0_i32 = arith.constant 0 : i32
    %2 = arith.minsi %1, %c0_i32 : i32
    %c0_i32_0 = arith.constant 0 : i32
    %c0_i32_1 = arith.constant 0 : i32
    return %2, %c0_i32_0 : i32, i32
  }
  func.func @transform_1(%arg0: i32, %arg1: i32) -> (i32, i32) {
    %c1_i32 = arith.constant 1 : i32
    %0 = arith.muli %arg0, %c1_i32 : i32
    %1 = arith.addi %0, %arg1 : i32
    %c0_i32 = arith.constant 0 : i32
    %2 = arith.minsi %1, %c0_i32 : i32
    %c0_i32_0 = arith.constant 0 : i32
    %c0_i32_1 = arith.constant 0 : i32
    return %2, %c0_i32_0 : i32, i32
  }
  func.func @transform_2(%arg0: i32, %arg1: i32) -> (i32, i32) {
    %c0_i32 = arith.constant 0 : i32
    %c0_i32_0 = arith.constant 0 : i32
    return %arg0, %c0_i32 : i32, i32
  }
}

</mosaic_0001>

<bundles_post_ra>
// kernel: spherical_axis_aligned_arc_loss.1
= control target key start
LH: loop header
LB: loop body
LE: loop exit
PB: predicated region body
PF: predicated region fallthrough
CT: control target
= control target key end

     0   :  { %s427_s0 = inlined_call_operand.vmem [shape: f32[8,1024], index: 0, kind: input, shape index: {}]   ;;  %s428_s1 = inlined_call_operand.vmem [shape: f32[8,1024], index: 1, kind: input, shape index: {}]   ;;  %s429_s2 = inlined_call_operand.vmem [shape: f32[8,128], index: 2, kind: output, shape index: {}]  }
   0x1   :  { %v93_v0 = vld [vmem:[%s427_s0] sm:$0xff]  ;;  %v94_v1 = vld [vmem:[%s427_s0 + $0x8] sm:$0xff]  ;;  %v95_v2 = vld [vmem:[%s427_s0 + $0x10] sm:$0xff] }
   0x2   :  { %v96_v3 = vld [vmem:[%s427_s0 + $0x18] sm:$0xff]  ;;  %v97_v4 = vld [vmem:[%s427_s0 + $0x20] sm:$0xff]  ;;  %v98_v5 = vld [vmem:[%s427_s0 + $0x28] sm:$0xff] }
   0x3   :  { %v99_v6 = vld [vmem:[%s427_s0 + $0x30] sm:$0xff]  ;;  %v100_v7 = vld [vmem:[%s427_s0 + $0x38] sm:$0xff]  ;;  %v103_v8 = vld [vmem:[%s428_s1] sm:$0xff] }
   0x4   :  { %v104_v9 = vld [vmem:[%s428_s1 + $0x8] sm:$0xff]  ;;  %v105_v10 = vld [vmem:[%s428_s1 + $0x10] sm:$0xff]  ;;  %v106_v11 = vld [vmem:[%s428_s1 + $0x18] sm:$0xff]  ;;  %v111_v12 = vsub.f32 %v93_v0, %v103_v8 }
   0x5   :  { %v107_v13 = vld [vmem:[%s428_s1 + $0x20] sm:$0xff]  ;;  %v108_v14 = vld [vmem:[%s428_s1 + $0x28] sm:$0xff]  ;;  %v109_v15 = vld [vmem:[%s428_s1 + $0x30] sm:$0xff]  ;;  %v112_v16 = vsub.f32 %v94_v1, %v104_v9  ;;  %v113_v17 = vsub.f32 %v95_v2, %v105_v10  ;;  %v114_v18 = vsub.f32 %v96_v3, %v106_v11 }
   0x6   :  { %v110_v19 = vld [vmem:[%s428_s1 + $0x38] sm:$0xff]  ;;  %v115_v20 = vsub.f32 %v97_v4, %v107_v13  ;;  %v116_v21 = vsub.f32 %v98_v5, %v108_v14  ;;  %v117_v22 = vsub.f32 %v99_v6, %v109_v15  ;;  %v119_v23 = vmul.f32 0.15915494, %v111_v12 }
   0x7   :  { %v118_v24 = vsub.f32 %v100_v7, %v110_v19  ;;  %v120_v25 = vmul.f32 0.15915494, %v112_v16  ;;  %v121_v26 = vmul.f32 0.15915494, %v113_v17  ;;  %v122_v27 = vmul.f32 0.15915494, %v114_v18 }
   0x8   :  { %v123_v28 = vmul.f32 0.15915494, %v115_v20  ;;  %v124_v29 = vmul.f32 0.15915494, %v116_v21  ;;  %v125_v30 = vmul.f32 0.15915494, %v117_v22 }
   0x9   :  { %v126_v31 = vmul.f32 0.15915494, %v118_v24  ;;  %v127_v32 = vadd.f32 0.5, %v119_v23  ;;  %v128_v33 = vadd.f32 0.5, %v120_v25  ;;  %v129_v34 = vadd.f32 0.5, %v121_v26 }
   0xa   :  { %v130_v35 = vadd.f32 0.5, %v122_v27  ;;  %v131_v36 = vadd.f32 0.5, %v123_v28  ;;  %v132_v37 = vadd.f32 0.5, %v124_v29  ;;  %v133_v38 = vadd.f32 0.5, %v125_v30 }
   0xb   :  { %v134_v39 = vadd.f32 0.5, %v126_v31  ;;  %v135_v40 = vfloor.f32 %v127_v32  ;;  %v136_v41 = vfloor.f32 %v128_v33  ;;  %v137_v42 = vfloor.f32 %v129_v34 }
   0xc   :  { %v138_v43 = vfloor.f32 %v130_v35  ;;  %v139_v44 = vfloor.f32 %v131_v36  ;;  %v140_v45 = vfloor.f32 %v132_v37  ;;  %v141_v46 = vfloor.f32 %v133_v38 }
   0xd   :  { %v143_v47 = vmul.f32 6.2831855, %v135_v40  ;;  %v144_v48 = vmul.f32 6.2831855, %v136_v41  ;;  %v145_v49 = vmul.f32 6.2831855, %v137_v42  ;;  %v142_v52 = vfloor.f32 %v134_v39 }
   0xe   :  { %v146_v50 = vmul.f32 6.2831855, %v138_v43  ;;  %v147_v51 = vmul.f32 6.2831855, %v139_v44  ;;  %v148_v53 = vmul.f32 6.2831855, %v140_v45 }
   0xf   :  { %v151_v54 = vsub.f32 %v111_v12, %v143_v47  ;;  %v152_v55 = vsub.f32 %v112_v16, %v144_v48  ;;  %v153_v56 = vsub.f32 %v113_v17, %v145_v49  ;;  %v149_v58 = vmul.f32 6.2831855, %v141_v46 }
  0x10   :  { %v154_v57 = vsub.f32 %v114_v18, %v146_v50  ;;  %v155_v59 = vsub.f32 %v115_v20, %v147_v51  ;;  %v150_v63 = vmul.f32 6.2831855, %v142_v52  ;;  %v156_v0 = vsub.f32 %v116_v21, %v148_v53 }
  0x11   :  { %v159_v60 = vmul.f32 %v151_v54, %v151_v54  ;;  %v160_v61 = vmul.f32 %v152_v55, %v152_v55  ;;  %v161_v62 = vmul.f32 %v153_v56, %v153_v56  ;;  %v157_v3 = vsub.f32 %v117_v22, %v149_v58 }
  0x12   :  { %v162_v1 = vmul.f32 %v154_v57, %v154_v57  ;;  %v163_v4 = vmul.f32 %v155_v59, %v155_v59  ;;  %v158_v6 = vsub.f32 %v118_v24, %v150_v63  ;;  %v164_v7 = vmul.f32 %v156_v0, %v156_v0 }
  0x13   :  { %v331_v2 = vadd.f32 %v160_v61, %v159_v60  ;;  %v165_v9 = vmul.f32 %v157_v3, %v157_v3 }
  0x14   :  { %v166_v11 = vmul.f32 %v158_v6, %v158_v6 }
  0x15   :  { %v333_v5 = vadd.f32 %v331_v2, %v161_v62 }
  0x17   :  { %v335_v8 = vadd.f32 %v333_v5, %v162_v1 }
  0x19   :  { %v337_v10 = vadd.f32 %v335_v8, %v163_v4 }
  0x1b   :  { %v339_v12 = vadd.f32 %v337_v10, %v164_v7 }
  0x1d   :  { %v341_v13 = vadd.f32 %v339_v12, %v165_v9 }
  0x1f   :  { %v343_v14 = vadd.f32 %v341_v13, %v166_v11 }
  0x21   :  { %344 = vst [vmem:[%s429_s2] sm:$0xff] %v343_v14 }

</bundles_post_ra>
